<compile_context>
chip_gen: v7x
topology: tpu7x:2x2x1
jax: 0.10.0
libtpu: 0.0.40
codegen_flags: <defaults>
</compile_context>

<pallas_src>
import jax
import jax.numpy as jnp
from jax.experimental import pallas as pl
from jax.experimental.pallas import tpu as pltpu

IN_FEATURES = 320
OUT_FEATURES = 64
PADDED_OUT = 128  # lane-dense output width (multiple of 128)


def _round_up(n, m):
    return ((n + m - 1) // m) * m


def _linear_kernel(x_ref, w_ref, b_ref, o_ref):
    # Single matmul over the full K=320 contraction (no K grid axis needed) +
    # broadcasted bias add.  Output block is (TB, 128): lane-dense stores.
    acc = jnp.dot(x_ref[...], w_ref[...], preferred_element_type=jnp.float32)
    o_ref[...] = (acc + b_ref[...]).astype(o_ref.dtype)


def projection_forward(x, weight_t, bias, *, block_rows=2048):
    """y = x @ weight_t + bias   (equivalent to torch.nn.Linear(320, 64))

    x:        (B, 320) float32
    weight_t: (320, 64) float32   (PyTorch weight transposed)
    bias:     (64,)    float32
    returns:  (B, 64)  float32
    """
    B, K = x.shape
    assert K == IN_FEATURES
    dtype = x.dtype

    # Zero-pad weight / bias out to 128 lanes so the output stores are
    # full-width (unmasked) vector stores.
    w_pad = jnp.zeros((IN_FEATURES, PADDED_OUT), weight_t.dtype)
    w_pad = w_pad.at[:, :OUT_FEATURES].set(weight_t)
    b_pad = jnp.zeros((1, PADDED_OUT), bias.dtype)
    b_pad = b_pad.at[0, :OUT_FEATURES].set(bias)

    # Row tile: multiple of 8, no larger than the (padded) batch, capped at
    # block_rows so double-buffered tiles stay small vs the VMEM budget
    # (re-derived for v7x's 64 MiB VMEM; ~2.6 MiB/buffer at TB=2048).
    tb = min(block_rows, _round_up(B, 8))
    tb = max(8, (tb // 8) * 8)

    # Pad the batch up to a multiple of the row tile (handles ragged B).
    b_rows = _round_up(B, tb)
    if b_rows != B:
        x_in = jnp.zeros((b_rows, IN_FEATURES), dtype).at[:B, :].set(x)
    else:
        x_in = x

    grid = (b_rows // tb,)

    # TODO(synk): if profiling shows exposed DMA on the x stream, add
    # pipeline_mode=pl.Buffered(3) to the x BlockSpec.  bf16 inputs with f32
    # accumulation would roughly halve HBM traffic if accuracy permits.
    out = pl.pallas_call(
        _linear_kernel,
        out_shape=jax.ShapeDtypeStruct((b_rows, PADDED_OUT), dtype),
        grid=grid,
        in_specs=[
            # Streamed batch tiles (double-buffered by the Pallas pipeline).
            pl.BlockSpec((tb, IN_FEATURES), lambda i: (i, 0)),
            # Weight & bias: constant index_map -> VMEM-resident across tiles.
            pl.BlockSpec((IN_FEATURES, PADDED_OUT), lambda i: (0, 0)),
            pl.BlockSpec((1, PADDED_OUT), lambda i: (0, 0)),
        ],
        out_specs=pl.BlockSpec((tb, PADDED_OUT), lambda i: (i, 0)),
        compiler_params=pltpu.CompilerParams(
            # Batch tiles are independent -> shard across TCs (v7x megacore).
            dimension_semantics=("parallel",),
        ),
    )(x_in, w_pad, b_pad)

    # Drop batch padding rows and the lane padding columns.
    return out[:B, :OUT_FEATURES]


if __name__ == "__main__":
    key = jax.random.PRNGKey(0)
    k_x, k_w, k_b = jax.random.split(key, 3)

    batch = 8
    # Deterministic parameter init (mimics nn.Linear's uniform(-1/sqrt(fan_in), ...))
    bound = 1.0 / jnp.sqrt(jnp.float32(IN_FEATURES))
    weight_t = jax.random.uniform(
        k_w, (IN_FEATURES, OUT_FEATURES), jnp.float32, -bound, bound
    )
    bias = jax.random.uniform(k_b, (OUT_FEATURES,), jnp.float32, -bound, bound)

    x = jax.random.normal(k_x, (batch, IN_FEATURES), jnp.float32)

    y = projection_forward(x, weight_t, bias)
    y = jax.block_until_ready(y)

    # Sanity check against plain JAX reference.
    y_ref = x @ weight_t + bias
    assert y.shape == (batch, OUT_FEATURES)
    assert jnp.allclose(y, y_ref, atol=1e-5, rtol=1e-5)

    print("KERNEL_OK")
</pallas_src>

<mosaic_0001>
module attributes {stable_mosaic.version = 11 : i64} {
  func.func @_linear_kernel(%arg0: i32, %arg1: memref<8x320xf32, #tpu.memory_space<vmem>>, %arg2: memref<320x128xf32, #tpu.memory_space<vmem>>, %arg3: memref<1x128xf32, #tpu.memory_space<vmem>>, %arg4: memref<8x128xf32, #tpu.memory_space<vmem>>) attributes {dimension_semantics = [#tpu.dimension_semantics<parallel>], iteration_bounds = array<i64: 1>, scalar_prefetch = 0 : i64, scratch_operands = 0 : i64, tpu.core_type = #tpu.core_type<tc>, window_params = [{transform_indices = @transform_0, window_bounds = array<i64: 8, 320>}, {pipeline_mode = #tpu.pipeline_mode<synchronous>, transform_indices = @transform_1, window_bounds = array<i64: 320, 128>}, {pipeline_mode = #tpu.pipeline_mode<synchronous>, transform_indices = @transform_2, window_bounds = array<i64: 1, 128>}, {transform_indices = @transform_3, window_bounds = array<i64: 8, 128>}]} {
    %c0 = arith.constant 0 : index
    %c0_0 = arith.constant 0 : index
    %0 = vector.load %arg1[%c0, %c0_0] : memref<8x320xf32, #tpu.memory_space<vmem>>, vector<8x320xf32>
    %c0_1 = arith.constant 0 : index
    %c0_2 = arith.constant 0 : index
    %1 = vector.load %arg2[%c0_1, %c0_2] : memref<320x128xf32, #tpu.memory_space<vmem>>, vector<320x128xf32>
    %cst = arith.constant dense<0.000000e+00> : vector<8x128xf32>
    %2 = tpu.matmul %0, %1, %cst {dimension_numbers = #tpu.dot_dimension_numbers<[1], [0], [0], [1], [0, 0, 1, 1], [], []>} : vector<8x320xf32>, vector<320x128xf32>, vector<8x128xf32> -> vector<8x128xf32>
    %c0_3 = arith.constant 0 : index
    %c0_4 = arith.constant 0 : index
    %3 = vector.load %arg3[%c0_3, %c0_4] : memref<1x128xf32, #tpu.memory_space<vmem>>, vector<1x128xf32>
    %4 = vector.broadcast %3 : vector<1x128xf32> to vector<8x128xf32>
    %5 = arith.addf %2, %4 : vector<8x128xf32>
    %c0_5 = arith.constant 0 : index
    %c0_6 = arith.constant 0 : index
    %6 = vector.load %arg4[%c0_5, %c0_6] : memref<8x128xf32, #tpu.memory_space<vmem>>, vector<8x128xf32>
    tpu.vector_store %arg4[%c0_5, %c0_6], %5 {strides = array<i32>} : memref<8x128xf32, #tpu.memory_space<vmem>>, vector<8x128xf32>,
    return
  }
  func.func @transform_0(%arg0: i32) -> (i32, i32) {
    %c0_i32 = arith.constant 0 : i32
    %c0_i32_0 = arith.constant 0 : i32
    return %arg0, %c0_i32 : i32, i32
  }
  func.func @transform_1(%arg0: i32) -> (i32, i32) {
    %c0_i32 = arith.constant 0 : i32
    %c0_i32_0 = arith.constant 0 : i32
    %c0_i32_1 = arith.constant 0 : i32
    return %c0_i32, %c0_i32_0 : i32, i32
  }
  func.func @transform_2(%arg0: i32) -> (i32, i32) {
    %c0_i32 = arith.constant 0 : i32
    %c0_i32_0 = arith.constant 0 : i32
    %c0_i32_1 = arith.constant 0 : i32
    return %c0_i32, %c0_i32_0 : i32, i32
  }
  func.func @transform_3(%arg0: i32) -> (i32, i32) {
    %c0_i32 = arith.constant 0 : i32
    %c0_i32_0 = arith.constant 0 : i32
    return %arg0, %c0_i32 : i32, i32
  }
}

</mosaic_0001>

<bundles_post_ra>
// kernel: tpu_custom_call.1
= control target key start
LH: loop header
LB: loop body
LE: loop exit
PB: predicated region body
PF: predicated region fallthrough
CT: control target
= control target key end

     0   :  { %8 = vsyncpa [#allocation3], 0  ;;  %s519_s0 = inlined_call_operand.hbm [shape: f32[8,320], index: 0, kind: input, shape index: {}]   ;;  %s520_s1 = inlined_call_operand.hbm [shape: f32[320,128], index: 1, kind: input, shape index: {}]   ;;  %s521_s2 = inlined_call_operand.vmem [shape: f32[1,128], index: 2, kind: input, shape index: {}]   ;;  %s522_s3 = inlined_call_operand.hbm [shape: f32[8,128], index: 3, kind: output, shape index: {}]  }
   0x1   :  { %9 = vsyncpa [#allocation6], 0 }
   0x2   :  { %10 = vsyncpa [#allocation4], 0  ;;  %s441_s12 = smov [#allocation2]   ;;  %s442_s14 = smov [#allocation5]  }
   0x3   :  { %s17_s13 = sshll.u32 %s441_s12, 4  ;;  %s26_s15 = sshll.u32 %s442_s14, 4  ;;  %s18_s13 = int_to_ptr.vmem [resolvable:$true] %s17_s13  ;;  %s469_s15 = int_to_ptr.vmem [resolvable:$true] %s26_s15 }
   0x4   :  { %s369_s18 = scalar_lea.hbm %s519_s0, 384 }
   0x5   :  { %p370_p0 = scmp.ne.s32.totalorder %s519_s0, %s369_s18  ;;  %p373_p1 = scmp.lt.u32.totalorder %s369_s18, %s519_s0 }
   0x7   :  { %p375_p2 = pnand %p373_p1, %p370_p0 }
   0x9   :  { %378 = shalt.err (!%p375_p2)
}
   0xa   :  { %s379_s23 = scalar_lea.vmem %s18_s13, 384  ;;  %p384_p4 = scmp.lt.s32.totalorder %s18_s13, %s18_s13 }
   0xb   :  { %p380_p3 = scmp.ne.s32.totalorder %s18_s13, %s379_s23  ;;  %p385_p5 = scmp.lt.s32.totalorder %s379_s23, %s379_s23 }
   0xd   :  { %p386_p6 = por %p385_p5, %p384_p4 }
   0xf   :  { %p387_p7 = pnand %p386_p6, %p380_p3 }
  0x11   :  { %390 = shalt.err (!%p387_p7)
}
  0x12   :  { %20 = dma.hbm_to_vmem [thread:$0]  %s519_s0, 384, %s18_s13, [#allocation3]  }
  0x13   :  { %s391_s28 = scalar_lea.hbm %s520_s1, 5120 }
  0x14   :  { %p392_p8 = scmp.ne.s32.totalorder %s520_s1, %s391_s28  ;;  %p395_p9 = scmp.lt.u32.totalorder %s391_s28, %s520_s1 }
  0x16   :  { %p397_p10 = pnand %p395_p9, %p392_p8 }
  0x18   :  { %400 = shalt.err (!%p397_p10)
}
  0x19   :  { %s401_s6 = scalar_lea.vmem %s469_s15, 5120  ;;  %p406_p12 = scmp.lt.s32.totalorder %s469_s15, %s469_s15 }
  0x1a   :  { %p402_p11 = scmp.ne.s32.totalorder %s469_s15, %s401_s6  ;;  %p407_p13 = scmp.lt.s32.totalorder %s401_s6, %s401_s6 }
  0x1c   :  { %p408_p0 = por %p407_p13, %p406_p12 }
  0x1e   :  { %p409_p1 = pnand %p408_p0, %p402_p11 }
  0x20   :  { %412 = shalt.err (!%p409_p1)
}
  0x21   :  { %s443_s0 = smov 128   ;;  %s444_s7 = smov 8  }
  0x22   :  { %32 = dma.hbm_to_vmem [thread:$0]  %s520_s1, 5120, %s469_s15, [#allocation6], %s443_s0, %s443_s0, %s444_s7  }
  0x23   :  { %435 = dma.done.wait [#allocation3], 384  }
  0x24   :  { %436 = vsyncadd [#allocation3], 4294966912 }
  0x25   :  { %437 = dma.done.wait [#allocation6], 5120  }
  0x26   :  { %438 = vsyncadd [#allocation6], 4294962176  ;;  %v445_v0 = vmov 0.0|0.0   ;;  %vm446_vm0 = vmmov 0   ;;  %v447_v1 = vmov 0.0   ;;  %v60_v2 = vld [vmem:[#allocation5 + $0x80] sm:$0xff] }
  0x27   :  { %349 = vmatprep.subr.bf16.mxu1 %v445_v0  ;;  %314 = vmatprep.mubr.msk.f32.mxu1 %vm446_vm0, %v447_v1  ;;  %v61_v3 = vld [vmem:[#allocation5 + $0x88] sm:$0xff]  ;;  %v44_v4 = vld [vmem:[#allocation5] sm:$0xff]  ;;  %v62_v7 = vld [vmem:[#allocation5 + $0x90] sm:$0xff]  ;;  %vm91_vm1 = vcmask 523264   ;;  %s448_s11 = smov [#allocation7]  }
  0x28   :  { %v317_v5 = vpack.c.bf16 %v61_v3, %v60_v2  ;;  %v45_v6 = vld [vmem:[#allocation5 + $0x8] sm:$0xff]  ;;  %v63_v8 = vld [vmem:[#allocation5 + $0x98] sm:$0xff]  ;;  %v46_v11 = vld [vmem:[#allocation5 + $0x10] sm:$0xff]  ;;  %s242_s12 = sshll.u32 %s448_s11, 4  ;;  %s243_s12 = int_to_ptr.vmem [resolvable:$true] %s242_s12 }
  0x29   :  { %v319_v9 = vpack.c.bf16 %v45_v6, %v44_v4  ;;  %v321_v10 = vpack.c.bf16 %v63_v8, %v62_v7  ;;  %v47_v12 = vld [vmem:[#allocation5 + $0x18] sm:$0xff]  ;;  %v64_v13 = vld [vmem:[#allocation5 + $0xa0] sm:$0xff]  ;;  %v65_v14 = vld [vmem:[#allocation5 + $0xa8] sm:$0xff]  ;;  %s413_s13 = scalar_lea.vmem %s243_s12, 128  ;;  %p418_p3 = scmp.lt.s32.totalorder %s243_s12, %s243_s12 }
  0x2a   :  { %318 = vmatprep.subr.bf16.mxu0 %v317_v5  ;;  %v323_v15 = vpack.c.bf16 %v47_v12, %v46_v11  ;;  %v325_v16 = vpack.c.bf16 %v65_v14, %v64_v13  ;;  %v48_v17 = vld [vmem:[#allocation5 + $0x20] sm:$0xff]  ;;  %v49_v18 = vld [vmem:[#allocation5 + $0x28] sm:$0xff]  ;;  %v66_v19 = vld [vmem:[#allocation5 + $0xb0] sm:$0xff]  ;;  %p414_p2 = scmp.ne.s32.totalorder %s243_s12, %s413_s13  ;;  %p419_p4 = scmp.lt.s32.totalorder %s413_s13, %s413_s13 }
  0x2b   :  { %320 = vmatpush3.bf16.msra.mxu0 %v319_v9  ;;  %v67_v20 = vld [vmem:[#allocation5 + $0xb8] sm:$0xff]  ;;  %v327_v21 = vpack.c.bf16 %v49_v18, %v48_v17  ;;  %v76_v22 = vld [vmem:[#allocation5 + $0x100] sm:$0xff]  ;;  %v77_v23 = vld [vmem:[#allocation5 + $0x108] sm:$0xff] }
  0x2c   :  { %322 = vmatprep.subr.bf16.mxu0 %v321_v10  ;;  %v329_v24 = vpack.c.bf16 %v67_v20, %v66_v19  ;;  %v50_v25 = vld [vmem:[#allocation5 + $0x30] sm:$0xff]  ;;  %v51_v26 = vld [vmem:[#allocation5 + $0x38] sm:$0xff]  ;;  %v68_v27 = vld [vmem:[#allocation5 + $0xc0] sm:$0xff]  ;;  %v350_v28 = vpack.c.bf16 %v77_v23, %v76_v22  ;;  %p420_p5 = por %p419_p4, %p418_p3 }
  0x2d   :  { %v69_v29 = vld [vmem:[#allocation5 + $0xc8] sm:$0xff]  ;;  %v78_v30 = vld [vmem:[#allocation5 + $0x110] sm:$0xff]  ;;  %v79_v31 = vld [vmem:[#allocation5 + $0x118] sm:$0xff]  ;;  %v331_v33 = vpack.c.bf16 %v51_v26, %v50_v25 }
  0x2e   :  { %351 = vmatpush3.bf16.msra.mxu1 %v350_v28  ;;  %v353_v32 = vpack.c.bf16 %v79_v31, %v78_v30  ;;  %v80_v34 = vld [vmem:[#allocation5 + $0x120] sm:$0xff]  ;;  %v81_v35 = vld [vmem:[#allocation5 + $0x128] sm:$0xff]  ;;  %v42_v36 = vld [vmem:[#allocation2 + $0x8] sm:$0xff]  ;;  %v333_v37 = vpack.c.bf16 %v69_v29, %v68_v27  ;;  %p421_p6 = pnand %p420_p5, %p414_p2 }
  0x2f   :  { %324 = vmatpush3.bf16.msra.mxu0 %v323_v15  ;;  %352 = vmatprep.subr.bf16.mxu1 %v445_v0  ;;  %v52_v38 = vld [vmem:[#allocation5 + $0x40] sm:$0xff]  ;;  %v53_v39 = vld [vmem:[#allocation5 + $0x48] sm:$0xff]  ;;  %v70_v40 = vld [vmem:[#allocation5 + $0xd0] sm:$0xff]  ;;  %v356_v42 = vpack.c.bf16 %v81_v35, %v80_v34 }
  0x30   :  { %326 = vmatprep.subr.bf16.mxu0 %v325_v16  ;;  %159 = vmatprep.mubr.f32.mxu0 %v42_v36  ;;  %v71_v41 = vld [vmem:[#allocation5 + $0xd8] sm:$0xff]  ;;  %v335_v43 = vpack.c.bf16 %v53_v39, %v52_v38  ;;  %v82_v44 = vld [vmem:[#allocation5 + $0x130] sm:$0xff]  ;;  %v72_v49 = vld [vmem:[#allocation5 + $0xe0] sm:$0xff] }
  0x31   :  { %v83_v45 = vld [vmem:[#allocation5 + $0x138] sm:$0xff]  ;;  %v337_v46 = vpack.c.bf16 %v71_v41, %v70_v40  ;;  %v54_v47 = vld [vmem:[#allocation5 + $0x50] sm:$0xff]  ;;  %v73_v50 = vld [vmem:[#allocation5 + $0xe8] sm:$0xff] }
  0x32   :  { %354 = vmatpush3.bf16.msra.mxu1 %v353_v32  ;;  %v55_v48 = vld [vmem:[#allocation5 + $0x58] sm:$0xff]  ;;  %v359_v51 = vpack.c.bf16 %v83_v45, %v82_v44  ;;  %v341_v53 = vpack.c.bf16 %v73_v50, %v72_v49  ;;  %v56_v54 = vld [vmem:[#allocation5 + $0x60] sm:$0xff]  ;;  %v57_v55 = vld [vmem:[#allocation5 + $0x68] sm:$0xff] }
  0x33   :  { %328 = vmatpush3.bf16.msra.mxu0 %v327_v21  ;;  %355 = vmatprep.subr.bf16.mxu1 %v445_v0  ;;  %v339_v52 = vpack.c.bf16 %v55_v48, %v54_v47  ;;  %v74_v56 = vld [vmem:[#allocation5 + $0xf0] sm:$0xff]  ;;  %v75_v57 = vld [vmem:[#allocation5 + $0xf8] sm:$0xff]  ;;  %v343_v59 = vpack.c.bf16 %v57_v55, %v56_v54  ;;  %v252_v5 = vld [vmem:[%s521_s2] ss:$0 sm:$0xff] }
  0x34   :  { %330 = vmatprep.subr.bf16.mxu0 %v329_v24  ;;  %v43_v58 = vld [vmem:[#allocation2 + $0x10] sm:$0xff]  ;;  %v345_v60 = vpack.c.bf16 %v75_v57, %v74_v56  ;;  %v58_v61 = vld [vmem:[#allocation5 + $0x70] sm:$0xff] }
  0x35   :  { %v59_v62 = vld [vmem:[#allocation5 + $0x78] sm:$0xff] }
  0x36   :  { %357 = vmatpush3.bf16.msra.mxu1 %v356_v42  ;;  %v347_v63 = vpack.c.bf16 %v59_v62, %v58_v61 }
  0x37   :  { %332 = vmatpush3.bf16.msra.mxu0 %v331_v33  ;;  %358 = vmatprep.subr.bf16.mxu1 %v445_v0  ;;  %v41_v0 = vld [vmem:[#allocation2] sm:$0xff] }
  0x38   :  { %334 = vmatprep.subr.bf16.mxu0 %v333_v37 }
  0x3a   :  { %360 = vmatpush3.bf16.msra.mxu1 %v359_v51 }
  0x3b   :  { %336 = vmatpush3.bf16.msra.mxu0 %v335_v43 }
  0x3c   :  { %338 = vmatprep.subr.bf16.mxu0 %v337_v46 }
  0x3d   :  { %315 = vmatmul.mubr.msk.f32.vlgmr.msra.gmra.mrb[0].mxu1 %vm91_vm1, %v43_v58 }
  0x3f   :  { %340 = vmatpush3.bf16.msra.mxu0 %v339_v52 }
  0x40   :  { %342 = vmatprep.subr.bf16.mxu0 %v341_v53 }
  0x43   :  { %344 = vmatpush3.bf16.msra.mxu0 %v343_v59 }
  0x44   :  { %346 = vmatprep.subr.bf16.mxu0 %v345_v60 }
  0x47   :  { %348 = vmatpush3.bf16.msra.mxu0 %v347_v63 }
  0x4a   :  { %160 = vmatmul.mubr.f32.vlgmr.msra.gmra.mrb[0].mxu0 %v41_v0 }
 0x110   :  { %v231_v1 = vpop.f32.mrb[0].mxu1 }
 0x111   :  { %v316_v2 = vpop.f32.mrb[1].mxu1 }
 0x11d   :  { %v286_v3 = vpop.f32.mrb[0].mxu0 }
 0x11e   :  { %v287_v4 = vpop.f32.mrb[1].mxu0 }
 0x11f   :  { %v288_v6 = vadd.f32 %v287_v4, %v286_v3 }
 0x121   :  { %v162_v7 = vadd.f32 %v288_v6, %v252_v5 }
 0x123   :  { %v232_v8 = vadd.f32 %v231_v1, %v162_v7 }
 0x125   :  { %235 = vst [vmem:[#allocation7] sm:$0xff] %v232_v8 }
 0x126   :  { %424 = shalt.err (!%p421_p6)
}
 0x127   :  { %s425_s16 = scalar_lea.hbm %s522_s3, 128 }
 0x128   :  { %p426_p7 = scmp.ne.s32.totalorder %s522_s3, %s425_s16  ;;  %p429_p8 = scmp.lt.u32.totalorder %s425_s16, %s522_s3 }
 0x12a   :  { %p431_p9 = pnand %p429_p8, %p426_p7 }
 0x12c   :  { %434 = shalt.err (!%p431_p9)
}
 0x12d   :  { %245 = dma.vmem_to_hbm [thread:$0]  %s243_s12, 128, %s522_s3, [#allocation4]  }
 0x12e   :  { %439 = dma.done.wait [#allocation4], 128  }
 0x12f   :  { %440 = vsyncadd [#allocation4], 4294967168 }
 0x130   :  { %249 = vsyncpa [#allocation3], 1 }
 0x131   :  { %250 = vsyncpa [#allocation6], 1 }
 0x132   :  { %251 = vsyncpa [#allocation4], 1 }

</bundles_post_ra>
